<compile_context>
chip_gen: v6e
topology: v6e:2x2x1
jax: 0.10.0
libtpu: 0.0.40
codegen_flags: <defaults>
</compile_context>

<pallas_src>
import functools
import math

import jax
import jax.numpy as jnp
from jax import lax
from jax.experimental import pallas as pl
from jax.experimental.pallas import tpu as pltpu


_NEG_BIG = -1e30  # stand-in for -inf on masked (padded) key columns
_Q_TILES = (512, 384, 256, 192, 128, 64)
_K_TILES = (512, 384, 256, 192, 128, 64)


def _round_up(x, m):
    return ((x + m - 1) // m) * m


def _choose_tile(n, preferred):
    """Pick a bounded tile for an axis of length n.

    Prefers the largest candidate that divides n exactly; otherwise the largest
    candidate <= n (caller pads the axis up to a multiple and masks / slices
    the ragged tail).  Tiny axes use the whole axis rounded up to 8.  Never
    falls back to the raw full length for large non-divisible axes, so the
    per-step VMEM working set stays bounded on every shape.
    """
    for t in preferred:
        if t <= n and n % t == 0:
            return t, n
    for t in preferred:
        if t <= n:
            return t, _round_up(n, t)
    t = _round_up(max(n, 1), 8)
    return t, t


def _vmem_cap_bytes():
    """~75% of physical VMEM (~48 MiB on v7x, ~96 MiB on v5e/v6e)."""
    phys = 64 * 1024 * 1024
    try:
        info = pltpu.get_tpu_info()
        phys = int(getattr(info, "vmem_capacity_bytes", phys))
    except Exception:
        pass
    return (phys * 3) // 4


def _flash_vmem_bytes(BB, TQ, TK, D, Dv, itemsize):
    """VMEM footprint of the flash path with correct layout padding.

    Inputs/outputs are double-buffered by the pipeline; the m/l scratch pads
    its size-1 lane dim to 128; the acc scratch is single-buffered f32.
    """
    d_pad = _round_up(D, 128)
    dv_pad = _round_up(Dv, 128)
    io = 2 * BB * (TQ * d_pad + TK * d_pad + TK * dv_pad + TQ * dv_pad) * itemsize
    scratch = BB * TQ * (128 + 128 + dv_pad) * 4
    return io + scratch


def _flash_attn_kernel(q_ref, k_ref, v_ref, o_ref, m_sc, l_sc, acc_sc, *,
                       scale, k_len, mask_k, compute_dtype):
    """Online-softmax attention.  Block refs are (BB, TQ/TK, D/Dv) slabs.

    Grid = (batch blocks, q blocks, k blocks); the k axis is a reduction
    ("arbitrary") carried in the m/l/acc VMEM scratch accumulators.
    """
    ki = pl.program_id(2)

    @pl.when(ki == 0)
    def _init():
        m_sc[...] = jnp.full_like(m_sc, -jnp.inf)
        l_sc[...] = jnp.zeros_like(l_sc)
        acc_sc[...] = jnp.zeros_like(acc_sc)

    # Fold 1/sqrt(D) into q (O(TQ*D) multiplies, not O(TQ*TK)); optional
    # low-precision compute dtype feeds the fast bf16 MXU path for f32 callers.
    q = (q_ref[...] * scale).astype(compute_dtype)          # (BB, TQ, D)
    k = k_ref[...].astype(compute_dtype)                    # (BB, TK, D)

    # Contract the shared D axis directly (no k.T materialized).
    s = jnp.einsum("bqd,bkd->bqk", q, k,
                   preferred_element_type=jnp.float32)      # (BB, TQ, TK)

    if mask_k:  # static: only True when Lk was padded up to a TK multiple
        col = ki * k_ref.shape[1] + lax.broadcasted_iota(jnp.int32, s.shape, 2)
        s = jnp.where(col < k_len, s, _NEG_BIG)

    m_prev = m_sc[...]
    m_new = jnp.maximum(m_prev, jnp.max(s, axis=-1, keepdims=True))
    alpha = jnp.exp(m_prev - m_new)
    p = jnp.exp(s - m_new)

    l_sc[...] = alpha * l_sc[...] + jnp.sum(p, axis=-1, keepdims=True)
    acc_sc[...] = alpha * acc_sc[...] + jnp.einsum(
        "bqk,bkd->bqd", p.astype(compute_dtype),
        v_ref[...].astype(compute_dtype),
        preferred_element_type=jnp.float32)
    m_sc[...] = m_new

    @pl.when(ki == pl.num_programs(2) - 1)
    def _finalize():
        # approx=True lowers to the EUP vrcp slot, idle in the finalize.
        o_ref[...] = (acc_sc[...] * pl.reciprocal(l_sc[...], approx=True)
                      ).astype(o_ref.dtype)


def _attn_with_weights_kernel(q_ref, k_ref, v_ref, o_ref, w_ref, *,
                              scale, compute_dtype):
    """Attention that also emits the softmax weights (full Lk per step)."""
    q = (q_ref[...] * scale).astype(compute_dtype)          # (1, TQ, D)
    k = k_ref[...].astype(compute_dtype)                    # (1, Lk, D)
    s = jnp.einsum("bqd,bkd->bqk", q, k,
                   preferred_element_type=jnp.float32)      # (1, TQ, Lk)
    m = jnp.max(s, axis=-1, keepdims=True)
    e = jnp.exp(s - m)
    denom = jnp.sum(e, axis=-1, keepdims=True)
    w = e * pl.reciprocal(denom, approx=True)
    w_ref[...] = w.astype(w_ref.dtype)
    o_ref[...] = jnp.einsum("bqk,bkd->bqd", w.astype(compute_dtype),
                            v_ref[...].astype(compute_dtype),
                            preferred_element_type=jnp.float32
                            ).astype(o_ref.dtype)


def dot_product_attention(q, k, v, dropout=0.0, valid_lens=None,
                          return_weights=False, compute_dtype=None):
    """Pallas scaled dot-product attention matching DotProductAtten.forward.

    Returns `out` (B, Lq, Dv); with return_weights=True also returns the
    softmax attention weights (the module's `attention_weights` attribute).
    """
    # TODO(synk): dropout on the attention weights is a no-op here (nn.Dropout
    #             eval/inference semantics); training-mode dropout not implemented.
    del dropout
    if valid_lens is not None:
        # TODO(synk): the masked (valid_lens != None) branch of the reference
        #             PyTorch code is itself broken; only the valid_lens=None
        #             path exists.
        raise NotImplementedError("valid_lens masking is not implemented")

    B, Lq, D = q.shape
    Bk, Lk, Dk = k.shape
    Bv, Lkv, Dv = v.shape
    assert (Bk, Dk) == (B, D) and (Bv, Lkv) == (B, Lk)

    if compute_dtype is None:
        # Keep input-dtype numerics by default; f32 callers may pass
        # compute_dtype=jnp.bfloat16 for a 3-6x MXU throughput win.
        compute_dtype = q.dtype
    compute_dtype = jnp.dtype(compute_dtype)

    itemsize = jnp.dtype(q.dtype).itemsize
    scale = 1.0 / math.sqrt(D)
    cap = _vmem_cap_bytes()

    if not return_weights:
        TQ, Lq_pad = _choose_tile(Lq, _Q_TILES)
        TK, Lk_pad = _choose_tile(Lk, _K_TILES)

        # Batch folding only amortizes the ~0.35us/step overhead for tiny
        # tiles; it does not help the MXU and multiplies VMEM/vreg pressure.
        BB = 1
        if TQ * TK < 256 * 256:
            for cand in (4, 2):
                if B % cand == 0:
                    BB = cand
                    break

        # Keep >= 2 "parallel" programs so v7x's second TensorCore gets work.
        while BB > 1 and (B // BB) * (Lq_pad // TQ) < 2:
            BB //= 2
        while B * (Lq_pad // TQ) < 2 and TQ > 64 and TQ % 16 == 0:
            TQ //= 2
            Lq_pad = _round_up(Lq, TQ)

        # Shrink tiles until the (layout-padded) working set fits the cap.
        while _flash_vmem_bytes(BB, TQ, TK, D, Dv, itemsize) > cap:
            if BB > 1:
                BB //= 2
            elif TK > 64 and TK % 16 == 0:
                TK //= 2
                Lk_pad = _round_up(Lk, TK)
            elif TQ > 64 and TQ % 16 == 0:
                TQ //= 2
                Lq_pad = _round_up(Lq, TQ)
            else:
                break

        qp, kp, vp = q, k, v
        if Lq_pad != Lq:
            qp = jnp.pad(q, ((0, 0), (0, Lq_pad - Lq), (0, 0)))
        if Lk_pad != Lk:
            kp = jnp.pad(k, ((0, 0), (0, Lk_pad - Lk), (0, 0)))
            vp = jnp.pad(v, ((0, 0), (0, Lk_pad - Lk), (0, 0)))
        mask_k = Lk_pad != Lk

        grid = (B // BB, Lq_pad // TQ, Lk_pad // TK)
        blk_bytes = _flash_vmem_bytes(BB, TQ, TK, D, Dv, itemsize)
        vmem_limit = int(min(cap, max(2 * blk_bytes, 32 * 1024 * 1024)))

        flops = 2 * B * Lq_pad * Lk_pad * (D + Dv)
        transcendentals = B * Lq_pad * Lk_pad
        # K/V are re-streamed once per q tile (their index_map depends on j only).
        bytes_accessed = int(
            (B * Lq_pad * (D + Dv)
             + (Lq_pad // TQ) * B * Lk_pad * (D + Dv)) * itemsize)

        kernel = functools.partial(
            _flash_attn_kernel, scale=scale, k_len=Lk, mask_k=mask_k,
            compute_dtype=compute_dtype)

        fn = pl.pallas_call(
            kernel,
            out_shape=jax.ShapeDtypeStruct((B, Lq_pad, Dv), q.dtype),
            grid_spec=pltpu.PrefetchScalarGridSpec(
                num_scalar_prefetch=0,
                grid=grid,
                in_specs=[
                    pl.BlockSpec((BB, TQ, D), lambda b, i, j: (b, i, 0)),
                    pl.BlockSpec((BB, TK, D), lambda b, i, j: (b, j, 0)),
                    pl.BlockSpec((BB, TK, Dv), lambda b, i, j: (b, j, 0)),
                ],
                out_specs=pl.BlockSpec((BB, TQ, Dv), lambda b, i, j: (b, i, 0)),
                scratch_shapes=[
                    pltpu.VMEM((BB, TQ, 1), jnp.float32),   # running max m
                    pltpu.VMEM((BB, TQ, 1), jnp.float32),   # running sum l
                    pltpu.VMEM((BB, TQ, Dv), jnp.float32),  # output accumulator
                ],
            ),
            compiler_params=pltpu.CompilerParams(
                dimension_semantics=("parallel", "parallel", "arbitrary"),
                vmem_limit_bytes=vmem_limit,
            ),
            cost_estimate=pl.CostEstimate(
                flops=flops, transcendentals=transcendentals,
                bytes_accessed=bytes_accessed),
        )
        out = fn(qp, kp, vp)
        if Lq_pad != Lq:
            out = out[:, :Lq, :]
        return out

    # Secondary path: also materialize the softmax weights.  BB=1 and a small
    # TQ bound the live (TQ, Lk) f32 intermediates; the K/V blocks take the
    # full Lk (block == full dim, so no (8,128) padding needed there).
    # TODO(synk): for very long Lk this path keeps full-Lk K/V blocks resident;
    #             a two-pass / online-softmax Lk tiling would bound that too.
    TQ, Lq_pad = _choose_tile(Lq, (128, 64))

    qp = q
    if Lq_pad != Lq:
        qp = jnp.pad(q, ((0, 0), (0, Lq_pad - Lq), (0, 0)))

    w_dtype = q.dtype  # written in input dtype to shrink the O(L^2) writeback
    w_itemsize = jnp.dtype(w_dtype).itemsize
    grid = (B, Lq_pad // TQ)

    d_pad = _round_up(D, 128)
    dv_pad = _round_up(Dv, 128)
    lk_lane = _round_up(Lk, 128)
    blk_bytes = 2 * ((TQ * d_pad + Lk * d_pad + Lk * dv_pad + TQ * dv_pad)
                     * itemsize + TQ * lk_lane * w_itemsize)
    vmem_limit = int(min(cap, max(2 * blk_bytes, 32 * 1024 * 1024)))

    flops = 2 * B * Lq_pad * Lk * (D + Dv)
    transcendentals = B * Lq_pad * Lk
    bytes_accessed = int(
        (B * Lq_pad * (D + Dv) + (Lq_pad // TQ) * B * Lk * (D + Dv)) * itemsize
        + B * Lq_pad * Lk * w_itemsize)

    kernel = functools.partial(_attn_with_weights_kernel, scale=scale,
                               compute_dtype=compute_dtype)

    fn = pl.pallas_call(
        kernel,
        out_shape=(
            jax.ShapeDtypeStruct((B, Lq_pad, Dv), q.dtype),
            jax.ShapeDtypeStruct((B, Lq_pad, Lk), w_dtype),
        ),
        grid_spec=pltpu.PrefetchScalarGridSpec(
            num_scalar_prefetch=0,
            grid=grid,
            in_specs=[
                pl.BlockSpec((1, TQ, D), lambda b, i: (b, i, 0)),
                pl.BlockSpec((1, Lk, D), lambda b, i: (b, 0, 0)),
                pl.BlockSpec((1, Lk, Dv), lambda b, i: (b, 0, 0)),
            ],
            out_specs=[
                pl.BlockSpec((1, TQ, Dv), lambda b, i: (b, i, 0)),
                pl.BlockSpec((1, TQ, Lk), lambda b, i: (b, i, 0)),
            ],
        ),
        compiler_params=pltpu.CompilerParams(
            dimension_semantics=("parallel", "parallel"),
            vmem_limit_bytes=vmem_limit,
        ),
        cost_estimate=pl.CostEstimate(
            flops=flops, transcendentals=transcendentals,
            bytes_accessed=bytes_accessed),
    )
    out, w = fn(qp, k, v)
    if Lq_pad != Lq:
        out = out[:, :Lq, :]
        w = w[:, :Lq, :]
    return out, w


def _reference(q, k, v):
    d = q.shape[-1]
    scores = jnp.einsum("bqd,bkd->bqk", q, k) / math.sqrt(d)
    w = jax.nn.softmax(scores.astype(jnp.float32), axis=-1)
    return jnp.einsum("bqk,bkd->bqd", w.astype(v.dtype), v), w


if __name__ == "__main__":
    key = jax.random.PRNGKey(0)
    kq, kk, kv = jax.random.split(key, 3)

    # Small shapes consistent with the module's bmm layout.
    B, Lq, Lk, D, Dv = 2, 8, 8, 32, 32
    q = jax.random.normal(kq, (B, Lq, D), dtype=jnp.float32)
    k = jax.random.normal(kk, (B, Lk, D), dtype=jnp.float32)
    v = jax.random.normal(kv, (B, Lk, Dv), dtype=jnp.float32)

    # Default (flash) path: returns only the output, like the module's forward.
    out = jax.block_until_ready(dot_product_attention(q, k, v, dropout=0.0))
    ref_out, ref_w = _reference(q, k, v)
    assert out.shape == (B, Lq, Dv)
    assert jnp.allclose(out, ref_out, atol=2e-3, rtol=2e-3)

    # Weights path reproduces the module's `attention_weights` attribute.
    out_w, attn_w = dot_product_attention(q, k, v, dropout=0.0,
                                          return_weights=True)
    out_w, attn_w = jax.block_until_ready((out_w, attn_w))
    assert out_w.shape == (B, Lq, Dv) and attn_w.shape == (B, Lq, Lk)
    assert jnp.allclose(out_w, ref_out, atol=2e-3, rtol=2e-3)
    assert jnp.allclose(attn_w, ref_w, atol=2e-3, rtol=2e-3)

    # Ragged (non-divisible) lengths exercise the pad + key-mask path.
    B2, Lq2, Lk2 = 2, 12, 10
    q2 = jax.random.normal(kq, (B2, Lq2, D), dtype=jnp.float32)
    k2 = jax.random.normal(kk, (B2, Lk2, D), dtype=jnp.float32)
    v2 = jax.random.normal(kv, (B2, Lk2, Dv), dtype=jnp.float32)
    out2 = jax.block_until_ready(dot_product_attention(q2, k2, v2))
    ref2, _ = _reference(q2, k2, v2)
    assert out2.shape == (B2, Lq2, Dv)
    assert jnp.allclose(out2, ref2, atol=2e-3, rtol=2e-3)

    print("KERNEL_OK")
</pallas_src>

<mosaic_0001>
module attributes {stable_mosaic.version = 11 : i64} {
  func.func @_flash_attn_kernel(%arg0: i32, %arg1: i32, %arg2: i32, %arg3: memref<1x8x32xf32, #tpu.memory_space<vmem>>, %arg4: memref<1x8x32xf32, #tpu.memory_space<vmem>>, %arg5: memref<1x8x32xf32, #tpu.memory_space<vmem>>, %arg6: memref<1x8x32xf32, #tpu.memory_space<vmem>>, %arg7: memref<1x8x1xf32, #tpu.memory_space<vmem>>, %arg8: memref<1x8x1xf32, #tpu.memory_space<vmem>>, %arg9: memref<1x8x32xf32, #tpu.memory_space<vmem>>) attributes {dimension_semantics = [#tpu.dimension_semantics<parallel>, #tpu.dimension_semantics<parallel>, #tpu.dimension_semantics<arbitrary>], iteration_bounds = array<i64: 2, 1, 1>, scalar_prefetch = 0 : i64, scratch_operands = 3 : i64, tpu.core_type = #tpu.core_type<tc>, window_params = [{transform_indices = @transform_0, window_bounds = array<i64: 1, 8, 32>}, {transform_indices = @transform_1, window_bounds = array<i64: 1, 8, 32>}, {transform_indices = @transform_2, window_bounds = array<i64: 1, 8, 32>}, {transform_indices = @transform_3, window_bounds = array<i64: 1, 8, 32>}]} {
    %c0_i32 = arith.constant 0 : i32
    %0 = arith.cmpi eq, %arg2, %c0_i32 : i32
    %1 = arith.extui %0 : i1 to i32
    %c0_i32_0 = arith.constant 0 : i32
    %2 = arith.cmpi ne, %1, %c0_i32_0 : i32
    scf.if %2 {
      %cst_33 = arith.constant 0xFF800000 : f32
      %34 = vector.broadcast %cst_33 : f32 to vector<1x8x1xf32>
      %c0_34 = arith.constant 0 : index
      %c0_35 = arith.constant 0 : index
      %c0_36 = arith.constant 0 : index
      %35 = vector.load %arg7[%c0_34, %c0_35, %c0_36] : memref<1x8x1xf32, #tpu.memory_space<vmem>>, vector<1x8x1xf32>
      tpu.vector_store %arg7[%c0_34, %c0_35, %c0_36], %34 {strides = array<i32>} : memref<1x8x1xf32, #tpu.memory_space<vmem>>, vector<1x8x1xf32>,
      %cst_37 = arith.constant 0.000000e+00 : f32
      %36 = vector.broadcast %cst_37 : f32 to vector<1x8x1xf32>
      %c0_38 = arith.constant 0 : index
      %c0_39 = arith.constant 0 : index
      %c0_40 = arith.constant 0 : index
      %37 = vector.load %arg8[%c0_38, %c0_39, %c0_40] : memref<1x8x1xf32, #tpu.memory_space<vmem>>, vector<1x8x1xf32>
      tpu.vector_store %arg8[%c0_38, %c0_39, %c0_40], %36 {strides = array<i32>} : memref<1x8x1xf32, #tpu.memory_space<vmem>>, vector<1x8x1xf32>,
      %cst_41 = arith.constant 0.000000e+00 : f32
      %38 = vector.broadcast %cst_41 : f32 to vector<1x8x32xf32>
      %c0_42 = arith.constant 0 : index
      %c0_43 = arith.constant 0 : index
      %c0_44 = arith.constant 0 : index
      %39 = vector.load %arg9[%c0_42, %c0_43, %c0_44] : memref<1x8x32xf32, #tpu.memory_space<vmem>>, vector<1x8x32xf32>
      tpu.vector_store %arg9[%c0_42, %c0_43, %c0_44], %38 {strides = array<i32>} : memref<1x8x32xf32, #tpu.memory_space<vmem>>, vector<1x8x32xf32>,
    } else {
    }
    %c0 = arith.constant 0 : index
    %c0_1 = arith.constant 0 : index
    %c0_2 = arith.constant 0 : index
    %3 = vector.load %arg3[%c0, %c0_1, %c0_2] : memref<1x8x32xf32, #tpu.memory_space<vmem>>, vector<1x8x32xf32>
    %cst = arith.constant 0.176776692 : f32
    %4 = vector.broadcast %cst : f32 to vector<1x8x32xf32>
    %5 = arith.mulf %3, %4 : vector<1x8x32xf32>
    %c0_3 = arith.constant 0 : index
    %c0_4 = arith.constant 0 : index
    %c0_5 = arith.constant 0 : index
    %6 = vector.load %arg4[%c0_3, %c0_4, %c0_5] : memref<1x8x32xf32, #tpu.memory_space<vmem>>, vector<1x8x32xf32>
    "tpu.trace_start"() <{level = 10 : i32, message = "bqd,bkd->bqk"}> : () -> ()
    %cst_6 = arith.constant dense<0.000000e+00> : vector<1x8x8xf32>
    %7 = tpu.matmul %5, %6, %cst_6 {dimension_numbers = #tpu.dot_dimension_numbers<[2], [2], [1], [1], [0, 0, 0, 1, 1, 1], [0], [0]>} : vector<1x8x32xf32>, vector<1x8x32xf32>, vector<1x8x8xf32> -> vector<1x8x8xf32>
    "tpu.trace_stop"() : () -> ()
    %c0_7 = arith.constant 0 : index
    %c0_8 = arith.constant 0 : index
    %c0_9 = arith.constant 0 : index
    %8 = vector.load %arg7[%c0_7, %c0_8, %c0_9] : memref<1x8x1xf32, #tpu.memory_space<vmem>>, vector<1x8x1xf32>
    %cst_10 = arith.constant dense<0xFF800000> : vector<1x8xf32>
    %9 = vector.multi_reduction <maximumf>, %7, %cst_10 [2] : vector<1x8x8xf32> to vector<1x8xf32>
    %10 = vector.shape_cast %9 : vector<1x8xf32> to vector<1x8x1xf32>
    %11 = arith.maximumf %8, %10 : vector<1x8x1xf32>
    %12 = arith.subf %8, %11 : vector<1x8x1xf32>
    %13 = math.exp %12 : vector<1x8x1xf32>
    %14 = vector.broadcast %11 : vector<1x8x1xf32> to vector<1x8x8xf32>
    %15 = arith.subf %7, %14 : vector<1x8x8xf32>
    %16 = math.exp %15 : vector<1x8x8xf32>
    %c0_11 = arith.constant 0 : index
    %c0_12 = arith.constant 0 : index
    %c0_13 = arith.constant 0 : index
    %17 = vector.load %arg8[%c0_11, %c0_12, %c0_13] : memref<1x8x1xf32, #tpu.memory_space<vmem>>, vector<1x8x1xf32>
    %18 = arith.mulf %13, %17 : vector<1x8x1xf32>
    %cst_14 = arith.constant dense<0.000000e+00> : vector<1x8xf32>
    %19 = vector.multi_reduction <add>, %16, %cst_14 [2] : vector<1x8x8xf32> to vector<1x8xf32>
    %20 = vector.shape_cast %19 : vector<1x8xf32> to vector<1x8x1xf32>
    %21 = arith.addf %18, %20 : vector<1x8x1xf32>
    %c0_15 = arith.constant 0 : index
    %c0_16 = arith.constant 0 : index
    %c0_17 = arith.constant 0 : index
    %22 = vector.load %arg8[%c0_15, %c0_16, %c0_17] : memref<1x8x1xf32, #tpu.memory_space<vmem>>, vector<1x8x1xf32>
    tpu.vector_store %arg8[%c0_15, %c0_16, %c0_17], %21 {strides = array<i32>} : memref<1x8x1xf32, #tpu.memory_space<vmem>>, vector<1x8x1xf32>,
    %c0_18 = arith.constant 0 : index
    %c0_19 = arith.constant 0 : index
    %c0_20 = arith.constant 0 : index
    %23 = vector.load %arg9[%c0_18, %c0_19, %c0_20] : memref<1x8x32xf32, #tpu.memory_space<vmem>>, vector<1x8x32xf32>
    %24 = vector.broadcast %13 : vector<1x8x1xf32> to vector<1x8x32xf32>
    %25 = arith.mulf %24, %23 : vector<1x8x32xf32>
    %c0_21 = arith.constant 0 : index
    %c0_22 = arith.constant 0 : index
    %c0_23 = arith.constant 0 : index
    %26 = vector.load %arg5[%c0_21, %c0_22, %c0_23] : memref<1x8x32xf32, #tpu.memory_space<vmem>>, vector<1x8x32xf32>
    "tpu.trace_start"() <{level = 10 : i32, message = "bqk,bkd->bqd"}> : () -> ()
    %cst_24 = arith.constant dense<0.000000e+00> : vector<1x8x32xf32>
    %27 = tpu.matmul %16, %26, %cst_24 {dimension_numbers = #tpu.dot_dimension_numbers<[2], [1], [1], [2], [0, 0, 0, 1, 1, 2], [0], [0]>} : vector<1x8x8xf32>, vector<1x8x32xf32>, vector<1x8x32xf32> -> vector<1x8x32xf32>
    "tpu.trace_stop"() : () -> ()
    %28 = arith.addf %25, %27 : vector<1x8x32xf32>
    %c0_25 = arith.constant 0 : index
    %c0_26 = arith.constant 0 : index
    %c0_27 = arith.constant 0 : index
    %29 = vector.load %arg9[%c0_25, %c0_26, %c0_27] : memref<1x8x32xf32, #tpu.memory_space<vmem>>, vector<1x8x32xf32>
    tpu.vector_store %arg9[%c0_25, %c0_26, %c0_27], %28 {strides = array<i32>} : memref<1x8x32xf32, #tpu.memory_space<vmem>>, vector<1x8x32xf32>,
    %c0_28 = arith.constant 0 : index
    %c0_29 = arith.constant 0 : index
    %c0_30 = arith.constant 0 : index
    %30 = vector.load %arg7[%c0_28, %c0_29, %c0_30] : memref<1x8x1xf32, #tpu.memory_space<vmem>>, vector<1x8x1xf32>
    tpu.vector_store %arg7[%c0_28, %c0_29, %c0_30], %11 {strides = array<i32>} : memref<1x8x1xf32, #tpu.memory_space<vmem>>, vector<1x8x1xf32>,
    %c0_i32_31 = arith.constant 0 : i32
    %31 = arith.cmpi eq, %arg2, %c0_i32_31 : i32
    %32 = arith.extui %31 : i1 to i32
    %c0_i32_32 = arith.constant 0 : i32
    %33 = arith.cmpi ne, %32, %c0_i32_32 : i32
    scf.if %33 {
      %c0_33 = arith.constant 0 : index
      %c0_34 = arith.constant 0 : index
      %c0_35 = arith.constant 0 : index
      %34 = vector.load %arg9[%c0_33, %c0_34, %c0_35] : memref<1x8x32xf32, #tpu.memory_space<vmem>>, vector<1x8x32xf32>
      %c0_36 = arith.constant 0 : index
      %c0_37 = arith.constant 0 : index
      %c0_38 = arith.constant 0 : index
      %35 = vector.load %arg8[%c0_36, %c0_37, %c0_38] : memref<1x8x1xf32, #tpu.memory_space<vmem>>, vector<1x8x1xf32>
      %36 = tpu.reciprocal %35 {approx = true} : vector<1x8x1xf32> -> vector<1x8x1xf32>
      %37 = vector.broadcast %36 : vector<1x8x1xf32> to vector<1x8x32xf32>
      %38 = arith.mulf %34, %37 : vector<1x8x32xf32>
      %c0_39 = arith.constant 0 : index
      %c0_40 = arith.constant 0 : index
      %c0_41 = arith.constant 0 : index
      %39 = vector.load %arg6[%c0_39, %c0_40, %c0_41] : memref<1x8x32xf32, #tpu.memory_space<vmem>>, vector<1x8x32xf32>
      tpu.vector_store %arg6[%c0_39, %c0_40, %c0_41], %38 {strides = array<i32>} : memref<1x8x32xf32, #tpu.memory_space<vmem>>, vector<1x8x32xf32>,
    } else {
    }
    return
  }
  func.func @transform_0(%arg0: i32, %arg1: i32, %arg2: i32) -> (i32, i32, i32) {
    %c0_i32 = arith.constant 0 : i32
    %c0_i32_0 = arith.constant 0 : i32
    return %arg0, %arg1, %c0_i32 : i32, i32, i32
  }
  func.func @transform_1(%arg0: i32, %arg1: i32, %arg2: i32) -> (i32, i32, i32) {
    %c0_i32 = arith.constant 0 : i32
    %c0_i32_0 = arith.constant 0 : i32
    return %arg0, %arg2, %c0_i32 : i32, i32, i32
  }
  func.func @transform_2(%arg0: i32, %arg1: i32, %arg2: i32) -> (i32, i32, i32) {
    %c0_i32 = arith.constant 0 : i32
    %c0_i32_0 = arith.constant 0 : i32
    return %arg0, %arg2, %c0_i32 : i32, i32, i32
  }
  func.func @transform_3(%arg0: i32, %arg1: i32, %arg2: i32) -> (i32, i32, i32) {
    %c0_i32 = arith.constant 0 : i32
    %c0_i32_0 = arith.constant 0 : i32
    return %arg0, %arg1, %c0_i32 : i32, i32, i32
  }
}

</mosaic_0001>

<bundles_post_ra>
// kernel: tpu_custom_call.1
= control target key start
LH: loop header
LB: loop body
LE: loop exit
PB: predicated region body
PF: predicated region fallthrough
CT: control target
= control target key end

     0   :  { %s1169_s0 = inlined_call_operand.hbm [shape: f32[2,8,32], index: 0, kind: input, shape index: {}]   ;;  %s1170_s1 = inlined_call_operand.hbm [shape: f32[2,8,32], index: 1, kind: input, shape index: {}]   ;;  %s1171_s2 = inlined_call_operand.hbm [shape: f32[2,8,32], index: 2, kind: input, shape index: {}]   ;;  %s1172_s3 = inlined_call_operand.hbm [shape: f32[2,8,32], index: 3, kind: output, shape index: {}]  }
   0x1   :  { %1176 = sst [smem:[#allocation17_spill]] %s1170_s1 }
   0x2   :  { %8 = vsyncpa [#allocation6], 0 }
   0x3   :  { %10 = vsyncpa [#allocation6 + $0x1], 0 }
   0x4   :  { %11 = vsyncpa [#allocation9], 0 }
   0x5   :  { %13 = vsyncpa [#allocation9 + $0x1], 0 }
   0x6   :  { %14 = vsyncpa [#allocation7], 0 }
   0x7   :  { %16 = vsyncpa [#allocation7 + $0x1], 0  ;;  %s959_s12 = smov 0   ;;  %s961_s13 = smov 0  }
   0x8   :  { %s963_s14 = smov 0   ;;  %s965_s15 = smov 0  }
   0x9   :  { %s967_s16 = smov 0   ;;  %s969_s17 = smov 0  }
   0xa LB: > { %1177 = sst [smem:[#allocation15_spill]] %s925_s16  ;;  %s990_s18 = sadd.s32 4294967295, %s929_s17   ;;  %s929_s17 = sphi %s969_s17, %s22_s17   ;;  %s925_s16 = sphi %s967_s16, %s1189_s16   ;;  %s921_s15 = sphi %s965_s15, %s1188_s15   ;;  %s917_s14 = sphi %s963_s14, %s1192_s14   ;;  %s913_s13 = sphi %s961_s13, %s1191_s13   ;;  %s909_s12 = sphi %s959_s12, %s1190_s12  }
   0xb   : > { %s642_s19 = sadd.s32 4294967294, %s929_s17   ;;  %s41_s20 = sadd.s32 1, %s925_s16 }
   0xc   : > { %s50_s21 = sadd.s32 1, %s917_s14  ;;  %p43_p0 = scmp.ge.s32.totalorder %s41_s20, 2 }
   0xd   : > { %p57_p1 = scmp.ne.s32.totalorder %s917_s14, %s913_s13  ;;  %p58_p2 = scmp.eq.s32.totalorder %s929_s17, 0 }
   0xe   : > { %p63_p3 = scmp.ne.s32.totalorder %s913_s13, %s909_s12  ;;  %s1194_s20 = smov (%p43_p0, %s41_s20), 0 }
   0xf   : > { %1178 = sst [smem:[#allocation16_spill]] %s1194_s20  ;;  %p1002_p4 = por %p58_p2, %p57_p1 }
  0x10   : > { %p64_p5 = scmp.eq.s32.totalorder %s990_s18, 0  ;;  %s45_s23 = ssub.s32 %s925_s16, %s1194_s20 }
  0x11   : > { %p145_p6 = scmp.eq.s32.totalorder %s990_s18, 1  ;;  %p48_p7 = scmp.eq.s32.totalorder %s45_s23, 0 }
  0x12   : > { %p1010_p8 = por %p64_p5, %p63_p3  ;;  %p151_p10 = scmp.eq.s32.totalorder %s642_s19, 1 }
  0x13   : > { %p1014_p9 = por %p145_p6, %p57_p1  ;;  %p699_p13 = scmp.lt.s32.totalorder %s929_s17, 2 }
  0x14   : > { %s1019_s26 = scalar_select %p48_p7, %s917_s14, %s50_s21  }
  0x15   : > { %p1021_p11 = por %p151_p10, %p63_p3  ;;  %s1173_s28 = sand.u32 1, %s917_s14  }
  0x16   : > { %s1030_s29 = sshll.u32 %s1173_s28, 3  ;;  %s1033_s30 = sshll.u32 %s925_s16, 7 }
  0x17   : > { %p1037_p0 = pnand %p699_p13, %p1002_p4  ;;  %s190_s5 = sand.u32 1, %s929_s17  }
  0x18   : > { %s1184_s1 = sld [smem:[#allocation17_spill]]  ;;  %s194_s9 = scalar_lea.vmem [#allocation8], %s1030_s29 }
  0x19   : > { %s202_s10 = sshll.u32 %s194_s9, 4  ;;  %p651_p1 = scmp.ge.s32.totalorder %s929_s17, 1  ;;  %s203_s10 = int_to_ptr.vmem [resolvable:$true] %s202_s10 }
  0x1a   : > { %p226_p2 = scmp.lt.s32.totalorder %s929_s17, 3  ;;  %s1049_s11 = scalar_lea.sflag [#allocation9], %s190_s5 }
  0x1b   : > { %p763_p3 = pneg %p1037_p0  ;;  %s774_s19 = scalar_lea.vmem %s203_s10, 128 }
  0x1c   : > { %p775_p4 = scmp.ne.s32.totalorder %s203_s10, %s774_s19  ;;  %s931_s21 = smov [#allocation8]  }
  0x1d   : > { %s779_s22 = sshll.u32 %s931_s21, 4  ;;  %s780_s22 = int_to_ptr.vmem [resolvable:$false] %s779_s22 }
  0x1e   : > { %s200_s8 = scalar_lea.hbm %s1184_s1, %s1033_s30  ;;  %p777_p5 = pnand %p775_p4, %p763_p3 }
  0x1f   : > { %s781_s23 = scalar_lea.vmem %s780_s22, 256  ;;  %p782_p7 = scmp.lt.s32.totalorder %s203_s10, %s780_s22 }
  0x20   : > { %p778_p6 = pneg %p777_p5  ;;  %p783_p10 = scmp.lt.s32.totalorder %s781_s23, %s774_s19 }
  0x22   : > { %p784_p13 = por %p783_p10, %p782_p7 }
  0x24   : > { %p785_p12 = pnand %p784_p13, %p778_p6 }
  0x26   : > { %788 = shalt.err (!%p785_p12)
}
  0x27   : > { %691 = dma.hbm_to_vmem [thread:$0]  (!%p1037_p0), %s200_s8, 128, %s203_s10, %s1049_s11  }
  0x28   : > { %p1063_p4 = pnand %p651_p1, %p226_p2  ;;  %s181_s9 = scalar_lea.hbm %s1169_s0, %s1033_s30 }
  0x29   : > { %s175_s19 = scalar_lea.vmem [#allocation5], %s1030_s29  ;;  %s219_s28 = scalar_lea.hbm %s1171_s2, %s1033_s30 }
  0x2a   : > { %s183_s21 = sshll.u32 %s175_s19, 4  ;;  %s1186_s1 = sand.u32 1, %s917_s14   ;;  %s184_s21 = int_to_ptr.vmem [resolvable:$true] %s183_s21 }
  0x2b   : > { %s172_s20 = scalar_lea.sflag [#allocation6], %s1186_s1  ;;  %s802_s8 = scalar_lea.vmem %s184_s21, 128 }
  0x2c   : > { %p803_p12 = scmp.ne.s32.totalorder %s184_s21, %s802_s8  ;;  %s932_s10 = smov [#allocation5]  }
  0x2d   : > { %s807_s16 = sshll.u32 %s932_s10, 4  ;;  %s808_s16 = int_to_ptr.vmem [resolvable:$false] %s807_s16 }
  0x2e   : > { %p805_p1 = pnand %p803_p12, %p763_p3  ;;  %s809_s6 = scalar_lea.vmem %s808_s16, 256 }
  0x2f   : > { %p810_p5 = scmp.lt.s32.totalorder %s184_s21, %s808_s16  ;;  %p811_p6 = scmp.lt.s32.totalorder %s809_s6, %s802_s8 }
  0x30   : > { %p806_p2 = pneg %p805_p1 }
  0x31   : > { %p812_p7 = por %p811_p6, %p810_p5 }
  0x33   : > { %p813_p10 = pnand %p812_p7, %p806_p2 }
  0x35   : > { %816 = shalt.err (!%p813_p10)
}
  0x36   : > { %688 = dma.hbm_to_vmem [thread:$0]  (!%p1037_p0), %s181_s9, 128, %s184_s21, %s172_s20  }
  0x37   : > { %s213_s1 = scalar_lea.vmem [#allocation10], %s1030_s29  ;;  %s933_s22 = smov [#allocation10]  }
  0x38   : > { %s221_s7 = sshll.u32 %s213_s1, 4  ;;  %s835_s16 = sshll.u32 %s933_s22, 4  ;;  %s222_s7 = int_to_ptr.vmem [resolvable:$true] %s221_s7  ;;  %s836_s16 = int_to_ptr.vmem [resolvable:$false] %s835_s16 }
  0x39   : > { %s830_s19 = scalar_lea.vmem %s222_s7, 128  ;;  %s837_s23 = scalar_lea.vmem %s836_s16, 256 }
  0x3a   : > { %p831_p13 = scmp.ne.s32.totalorder %s222_s7, %s830_s19  ;;  %p838_p2 = scmp.lt.s32.totalorder %s222_s7, %s836_s16 }
  0x3b   : > { %p839_p5 = scmp.lt.s32.totalorder %s837_s23, %s830_s19 }
  0x3c   : > { %p833_p12 = pnand %p831_p13, %p763_p3 }
  0x3d   : > { %p840_p6 = por %p839_p5, %p838_p2 }
  0x3e   : > { %p834_p1 = pneg %p833_p12 }
  0x40   : > { %p841_p7 = pnand %p840_p6, %p834_p1 }
  0x42   : > { %844 = shalt.err (!%p841_p7)
}
  0x43   : > { %694 = dma.hbm_to_vmem [thread:$0]  (!%p1037_p0), %s219_s28, 128, %s222_s7, %s1049_s11  }
  0x44   : > { %230 = sbr.rel (%p1063_p4) target bundleno = 861 (0x35d), region = 32  ;;  %s1098_s9 = sand.u32 (!%p1063_p4), 1, %s913_s13  }
  0x45   : > { %s1101_s21 = sshll.u32 (!%p1063_p4), %s1098_s9, 3  ;;  %s233_s4 = scalar_lea.sflag (!%p1063_p4), [#allocation6], %s1098_s9 }
  0x46   : > { %s236_s8 = scalar_lea.vmem (!%p1063_p4), [#allocation5], %s1101_s21 }
  0x49   : > { %896 = dma.done.wait (%p1010_p8), %s233_s4, 128  }
  0x4a   : > { %898 = vsyncadd (%p1010_p8), %s233_s4, 4294967168  ;;  %s241_s28 = sand.u32 1, %s990_s18   ;;  %s245_s11 = scalar_lea.vmem [#allocation8], %s1101_s21 }
  0x4b   : > { %s242_s30 = scalar_lea.sflag [#allocation9], %s241_s28 }
  0x4c   : > { %900 = dma.done.wait (%p1010_p8), %s242_s30, 256  }
  0x4d   : > { %902 = vsyncadd (%p1010_p8), %s242_s30, 4294967040  ;;  %vm294_vm0 = vcmask 261120   ;;  %v934_v0 = vmov 0.0   ;;  %vm935_vm1 = vmmov 0   ;;  %v298_v1 = vld [vmem:[%s245_s11] sm:$0xff]  ;;  %v296_v2 = vld [vmem:[%s236_s8] sm:$0xff] }
  0x4e   : > { %667 = vmatprep.subr.mxu0 %v934_v0  ;;  %295 = vst.msk [vmem:[#allocation4] sm:$0xff] %vm294_vm0, %v934_v0  ;;  %669 = vmatprep.mubr.msk.f32.mxu0 %vm935_vm1, %v934_v0  ;;  %v297_v3 = vmul.f32 0.17677669, %v296_v2  ;;  %vm291_vm2 = vcmask 7168   ;;  %v936_v4 = vmov -inf   ;;  %vm377_vm3 = vcmask 64512  }
  0x4f   : > { %672 = vmatprep.subr.mxu1 %v934_v0  ;;  %674 = vmatprep.mubr.msk.f32.mxu1 %vm935_vm1, %v934_v0  ;;  %292 = vst.msk [vmem:[#allocation2] sm:$0xff] %vm291_vm2, %v936_v4  ;;  %293 = vst.msk [vmem:[#allocation3] sm:$0xff] %vm291_vm2, %v934_v0  ;;  %v937_v8 = vmov 0   ;;  %s254_s18 = scalar_lea.vmem [#allocation10], %s1101_s21  ;;  %s660_s24 = sshll.u32 %s921_s15, 7 }
  0x50   : > { %668 = vmatpush3.xpose.msk.msra.mxu0 %vm294_vm0, %v298_v1  ;;  %753 = vset.pattern.permute.xlu0 %v937_v8  ;;  %v408_v13 = vld [vmem:[%s254_s18] sm:$0xff]  ;;  %s286_s5 = scalar_lea.vmem [#allocation11], %s1101_s21  ;;  %s511_s7 = scalar_lea.hbm %s1172_s3, %s660_s24 }
  0x51   : > { %754 = vset.pattern.permute.xlu1 %v937_v8  ;;  %673 = vmatpush3.msra.mxu1 %v408_v13  ;;  %s513_s10 = sshll.u32 %s286_s5, 4  ;;  %s499_s19 = scalar_lea.sflag [#allocation7], %s1098_s9  ;;  %s514_s10 = int_to_ptr.vmem [resolvable:$true] %s513_s10 }
  0x52   : > { %s845_s22 = scalar_lea.vmem %s514_s10, 128  ;;  %s938_s16 = smov [#allocation11]  }
  0x53   : > { %670 = vmatmul.mubr.msk.f32.vlgmr.msra.gmra.mxu0 %vm294_vm0, %v297_v3  ;;  %p846_p8 = scmp.ne.s32.totalorder %s514_s10, %s845_s22  ;;  %s849_s15 = sshll.u32 %s938_s16, 4  ;;  %s850_s15 = int_to_ptr.vmem [resolvable:$false] %s849_s15 }
  0x54   : > { %s851_s23 = scalar_lea.vmem %s850_s15, 256  ;;  %p852_p4 = scmp.lt.s32.totalorder %s514_s10, %s850_s15 }
  0x55   : > { %v401_v27 = vld [vmem:[#allocation4] sm:$0xff]  ;;  %p847_p0 = pnand %p846_p8, %p1014_p9  ;;  %p853_p10 = scmp.lt.s32.totalorder %s851_s23, %s845_s22 }
  0x56   : > { %v376_v9 = vld [vmem:[#allocation2] sm:$0xff]  ;;  %v393_v21 = vld [vmem:[#allocation3] sm:$0xff] }
  0x57   : > { %p848_p3 = pneg %p847_p0  ;;  %p854_p13 = por %p853_p10, %p852_p4 }
  0x59   : > { %p855_p12 = pnand %p854_p13, %p848_p3 }
 0x113   : > { %v372_v5 = vpop.f32.mrf.mxu0 }
 0x114   : > { %v378_v6 = vsel %vm377_vm3, %v372_v5, -inf }
 0x115   : > { %379 = vmax.xlane.f32.xlu0 %v378_v6  ;;  %v671_v7 = vpop.f32.mrf.mxu0 }
 0x19e   : > { %v380_v10 = vpop.xlane.xlu0 %379 }
 0x19f   : > { %v381_v11 = vmax.f32 %v376_v9, %v380_v10 }
 0x1a1   : > { %v382_v12 = vsub.f32 %v376_v9, %v381_v11  ;;  %484 = vst.msk [vmem:[#allocation2] sm:$0xff] %vm291_vm2, %v381_v11  ;;  %387 = vperm.xlu0 %753, %v381_v11  }
 0x1a3   : > { %v383_v18 = vmul.f32 1.442695, %v382_v12 }
 0x21c   : > { %v388_v14 = vpop.permute.xlu0 %387 }
 0x21d   : > { %v390_v15 = vsub.f32 %v372_v5, %v388_v14 }
 0x21f   : > { %v391_v16 = vmul.f32 1.442695, %v390_v15 }
 0x221   : > { %755 = vpow2.f32 %v391_v16 }
 0x222   : > { %757 = vpow2.f32 %v383_v18 }
 0x22e   : > { %v756_v17 = vpop.eup %755 }
 0x22f   : > { %675 = vmatmul.mubr.msk.f32.vlgmr.msra.gmra.mxu1 %vm377_vm3, %v756_v17  ;;  %v395_v19 = vsel %vm377_vm3, %v756_v17, 0.0  ;;  %v758_v20 = vpop.eup %757 }
 0x230   : > { %396 = vadd.xlane.f32.xlu1 %v395_v19  ;;  %v394_v22 = vmul.f32 %v758_v20, %v393_v21 }
 0x241   : > { %404 = vperm.xlu1 %754, %v758_v20  }
 0x2b9   : > { %v397_v23 = vpop.xlane.xlu1 %396 }
 0x2ba   : > { %v398_v24 = vadd.f32 %v397_v23, %v394_v22 }
 0x2bc   : > { %400 = vst.msk [vmem:[#allocation3] sm:$0xff] %vm291_vm2, %v398_v24 }
 0x2bd   : > { %v405_v28 = vpop.permute.xlu1 %404 }
 0x2be   : > { %v407_v29 = vmul.f32 %v405_v28, %v401_v27 }
 0x2c3   : > { %v489_v25 = vld [vmem:[#allocation3] sm:$0xff] }
 0x2c4   : > { %759 = vrcp.f32 %v489_v25 }
 0x2d1   : > { %v760_v26 = vpop.eup %759 }
 0x2d2   : > { %493 = vperm.xlu1 %754, %v760_v26  }
 0x2ef   : > { %v478_v30 = vpop.f32.mrf.mxu1 }
 0x2f0   : > { %v482_v31 = vadd.f32 %v478_v30, %v407_v29 }
 0x2f1   : > { %v676_v32 = vpop.f32.mrf.mxu1 }
 0x2f2   : > { %483 = vst.msk [vmem:[#allocation4] sm:$0xff] %vm294_vm0, %v482_v31 }
 0x2f9   : > { %v488_v33 = vld [vmem:[#allocation4] sm:$0xff] }
 0x34d   : > { %v494_v34 = vpop.permute.xlu1 %493 }
 0x34e   : > { %v496_v35 = vmul.f32 %v494_v34, %v488_v33 }
 0x350   : > { %497 = vst.msk [vmem:[%s286_s5] sm:$0xff] %vm294_vm0, %v496_v35 }
 0x351   : > { %858 = shalt.err (!%p855_p12)
}
 0x352   : > { %s859_s20 = scalar_lea.hbm %s511_s7, 128  ;;  %s863_s21 = scalar_lea.hbm %s1172_s3, 256 }
 0x353   : > { %p860_p1 = scmp.ne.s32.totalorder %s511_s7, %s859_s20  ;;  %p864_p6 = scmp.lt.s32.totalorder %s511_s7, %s1172_s3 }
 0x354   : > { %p865_p7 = scmp.lt.s32.totalorder %s863_s21, %s859_s20 }
 0x355   : > { %p861_p2 = pnand %p860_p1, %p1014_p9 }
 0x356   : > { %p866_p8 = por %p865_p7, %p864_p6 }
 0x357   : > { %p862_p5 = pneg %p861_p2 }
 0x359   : > { %p867_p0 = pnand %p866_p8, %p862_p5 }
 0x35b   : > { %870 = shalt.err (!%p867_p0)
}
 0x35c   : > { %683 = dma.vmem_to_hbm [thread:$0]  (%p1014_p9), %s514_s10, 128, %s511_s7, %s499_s19  }
 0x35d PF: > { %s525_s28 = sand.u32 1, %s909_s12   ;;  %p1187_p3 = scmp.ge.s32.totalorder %s929_s17, 2 }
 0x35e   : > { %s526_s30 = scalar_lea.sflag [#allocation7], %s525_s28 }
 0x35f   : > { %p696_p4 = pnand %p1187_p3, %p1021_p11 }
 0x361   : > { %p697_p10 = pneg %p696_p4 }
 0x363   : > { %904 = dma.done.wait (%p697_p10), %s526_s30, 128  }
 0x364   : > { %906 = vsyncadd (%p697_p10), %s526_s30, 4294967168  ;;  %s22_s17 = sadd.s32 1, %s929_s17   ;;  %s1188_s15 = sld [smem:[#allocation15_spill]] }
 0x365   : > { %p19_p13 = scmp.ge.s32.totalorder %s22_s17, 4   ;;  %s1189_s16 = sld [smem:[#allocation16_spill]] }
 0x366   : > { %s1190_s12 = smov %s913_s13  ;;  %s1191_s13 = smov %s917_s14 }
 0x367   : > { %s1192_s14 = smov %s1019_s26  ;;  %21 = sbr.rel (!%p19_p13) target bundleno = 10 (0xa), region = 109 }
 0x36c   :  { %531 = vsyncpa [#allocation6], 1 }
 0x36d   :  { %533 = vsyncpa [#allocation6 + $0x1], 1 }
 0x36e   :  { %534 = vsyncpa [#allocation9], 1 }
 0x36f   :  { %536 = vsyncpa [#allocation9 + $0x1], 1 }
 0x370   :  { %537 = vsyncpa [#allocation7], 1 }
 0x371   :  { %539 = vsyncpa [#allocation7 + $0x1], 1 }

</bundles_post_ra>
